<compile_context>
chip_gen: v5e
topology: v5e:2x2
jax: 0.10.0
libtpu: 0.0.40
codegen_flags: <defaults>
</compile_context>

<pallas_src>
import jax
import jax.numpy as jnp
from jax.experimental import pallas as pl
from jax.experimental.pallas import tpu as pltpu

_SUBLANE = 8
_WIDE = 1024                       # lane width for the tiled (large-input) path
_TILE_R = 256                      # rows per grid step (multiple of 32 for int8 tiling)
_TILED_THRESHOLD = 2 * _TILE_R * _WIDE   # elements; below this use single-block path


def _elementwise_kernel(x_ref, add_ref, sub_ref, mul_ref, div_ref, pow_ref,
                        cmp_ref):
    x = x_ref[...]
    add_ref[...] = x + 2.0
    sub_ref[...] = x - 2.0
    mul_ref[...] = x * 2.0
    div_ref[...] = x * 0.5           # x / 2
    pow_ref[...] = x * x             # x ** 2
    # Comparison stored as int8 (0/1); reinterpreted as bool in the wrapper.
    cmp_ref[...] = (x > 1.0).astype(jnp.int8)


def _call_single_block(x2d):
    """grid=() path for small inputs: one block == whole array."""
    rows, cols = x2d.shape
    dt = x2d.dtype
    block = pl.BlockSpec((rows, cols), lambda: (0, 0))
    out_shapes = tuple(jax.ShapeDtypeStruct((rows, cols), dt) for _ in range(5)) + (
        jax.ShapeDtypeStruct((rows, cols), jnp.int8),)
    return pl.pallas_call(
        _elementwise_kernel,
        out_shape=out_shapes,
        in_specs=[block],
        out_specs=tuple(block for _ in range(6)),
    )(x2d)


def _call_tiled(x2d):
    """Pipelined path for large inputs: 1-D grid over row tiles."""
    rows, cols = x2d.shape           # rows % _TILE_R == 0, cols == _WIDE
    dt = x2d.dtype
    grid = (rows // _TILE_R,)
    block = pl.BlockSpec((_TILE_R, cols), lambda i: (i, 0))
    out_shapes = tuple(jax.ShapeDtypeStruct((rows, cols), dt) for _ in range(5)) + (
        jax.ShapeDtypeStruct((rows, cols), jnp.int8),)
    return pl.pallas_call(
        _elementwise_kernel,
        out_shape=out_shapes,
        grid=grid,
        in_specs=[block],
        out_specs=tuple(block for _ in range(6)),
        compiler_params=pltpu.CompilerParams(
            # Row tiles are independent -> 'parallel' lets v7x shard over 2 TCs.
            dimension_semantics=("parallel",),
            # ~12.5 MiB of double-buffered tiles; 32 MiB scoped limit is safe on
            # all generations (v7x physical VMEM = 64 MiB).
            vmem_limit_bytes=32 * 1024 * 1024,
        ),
    )(x2d)


def pt_module_forward(x):
    """Reproduces PtModule.forward for a floating-point NCHW tensor."""
    orig_shape = x.shape
    orig_dtype = x.dtype
    n = x.size
    x_flat = jnp.reshape(x, (-1,))

    if n >= _TILED_THRESHOLD:
        # Large path: lane-dense (rows, 1024) slab, pad rows to a tile multiple.
        cols = _WIDE
        tile_elems = _TILE_R * cols
        n_pad = pl.cdiv(n, tile_elems) * tile_elems
        if n_pad != n:
            x_flat = jnp.pad(x_flat, (0, n_pad - n))
        x2d = jnp.reshape(x_flat, (n_pad // cols, cols))
        outs = _call_tiled(x2d)
    else:
        # Small path: pick the widest lane dim that divides n exactly so the
        # wrapper needs no padding and no post-kernel slicing.
        cols = None
        for w in (2048, 1024, 512, 256, 128):
            if n % (_SUBLANE * w) == 0:
                cols = w
                break
        if cols is None:
            cols = 128
            tile_elems = _SUBLANE * cols
            n_pad = pl.cdiv(n, tile_elems) * tile_elems
            x_flat = jnp.pad(x_flat, (0, n_pad - n))
        else:
            n_pad = n
        x2d = jnp.reshape(x_flat, (n_pad // cols, cols))
        outs = _call_single_block(x2d)

    padded = n_pad != n

    def _unflatten(y):
        if padded:
            y = jnp.reshape(y, (-1,))[:n]
        return jnp.reshape(y, orig_shape)

    float_outs = outs[:5]
    if float_outs[0].dtype != orig_dtype:
        # Only materializes a cast if the kernel dtype differs (it doesn't for f32).
        float_outs = tuple(o.astype(orig_dtype) for o in float_outs)

    return {
        'addition': _unflatten(float_outs[0]),
        'subtraction': _unflatten(float_outs[1]),
        'multiplication': _unflatten(float_outs[2]),
        'division': _unflatten(float_outs[3]),
        'power': _unflatten(float_outs[4]),
        'comparison': _unflatten(outs[5]) != 0,   # int8 -> bool, cheap view-like op
    }


if __name__ == "__main__":
    key = jax.random.PRNGKey(0)
    # NCHW input, small shapes: batch=2, channels=4, spatial=16x16.
    x = jax.random.normal(key, (2, 4, 16, 16), dtype=jnp.float32) * 2.0

    out = jax.jit(pt_module_forward)(x)
    jax.block_until_ready(out)

    # Correctness check against plain JAX reference.
    ref = {
        'addition': x + 2,
        'subtraction': x - 2,
        'multiplication': x * 2,
        'division': x / 2,
        'power': x ** 2,
        'comparison': x > 1,
    }
    for k in ref:
        if ref[k].dtype == jnp.bool_:
            assert out[k].dtype == jnp.bool_, k
            assert bool(jnp.all(out[k] == ref[k])), k
        else:
            assert out[k].dtype == ref[k].dtype, k
            assert bool(jnp.allclose(out[k], ref[k], atol=1e-6)), k

    print("KERNEL_OK")
</pallas_src>

<mosaic_0001>
module attributes {stable_mosaic.version = 11 : i64} {
  func.func @_elementwise_kernel(%arg0: memref<8x256xf32, #tpu.memory_space<vmem>>, %arg1: memref<8x256xf32, #tpu.memory_space<vmem>>, %arg2: memref<8x256xf32, #tpu.memory_space<vmem>>, %arg3: memref<8x256xf32, #tpu.memory_space<vmem>>, %arg4: memref<8x256xf32, #tpu.memory_space<vmem>>, %arg5: memref<8x256xf32, #tpu.memory_space<vmem>>, %arg6: memref<8x256xi8, #tpu.memory_space<vmem>>) attributes {dimension_semantics = [], scalar_prefetch = 0 : i64, scratch_operands = 0 : i64, tpu.core_type = #tpu.core_type<tc>} {
    %c0 = arith.constant 0 : index
    %c0_0 = arith.constant 0 : index
    %0 = vector.load %arg0[%c0, %c0_0] : memref<8x256xf32, #tpu.memory_space<vmem>>, vector<8x256xf32>
    %cst = arith.constant 2.000000e+00 : f32
    %1 = vector.broadcast %cst : f32 to vector<8x256xf32>
    %2 = arith.addf %0, %1 : vector<8x256xf32>
    %c0_1 = arith.constant 0 : index
    %c0_2 = arith.constant 0 : index
    %3 = vector.load %arg1[%c0_1, %c0_2] : memref<8x256xf32, #tpu.memory_space<vmem>>, vector<8x256xf32>
    tpu.vector_store %arg1[%c0_1, %c0_2], %2 {strides = array<i32>} : memref<8x256xf32, #tpu.memory_space<vmem>>, vector<8x256xf32>,
    %cst_3 = arith.constant 2.000000e+00 : f32
    %4 = vector.broadcast %cst_3 : f32 to vector<8x256xf32>
    %5 = arith.subf %0, %4 : vector<8x256xf32>
    %c0_4 = arith.constant 0 : index
    %c0_5 = arith.constant 0 : index
    %6 = vector.load %arg2[%c0_4, %c0_5] : memref<8x256xf32, #tpu.memory_space<vmem>>, vector<8x256xf32>
    tpu.vector_store %arg2[%c0_4, %c0_5], %5 {strides = array<i32>} : memref<8x256xf32, #tpu.memory_space<vmem>>, vector<8x256xf32>,
    %cst_6 = arith.constant 2.000000e+00 : f32
    %7 = vector.broadcast %cst_6 : f32 to vector<8x256xf32>
    %8 = arith.mulf %0, %7 : vector<8x256xf32>
    %c0_7 = arith.constant 0 : index
    %c0_8 = arith.constant 0 : index
    %9 = vector.load %arg3[%c0_7, %c0_8] : memref<8x256xf32, #tpu.memory_space<vmem>>, vector<8x256xf32>
    tpu.vector_store %arg3[%c0_7, %c0_8], %8 {strides = array<i32>} : memref<8x256xf32, #tpu.memory_space<vmem>>, vector<8x256xf32>,
    %cst_9 = arith.constant 5.000000e-01 : f32
    %10 = vector.broadcast %cst_9 : f32 to vector<8x256xf32>
    %11 = arith.mulf %0, %10 : vector<8x256xf32>
    %c0_10 = arith.constant 0 : index
    %c0_11 = arith.constant 0 : index
    %12 = vector.load %arg4[%c0_10, %c0_11] : memref<8x256xf32, #tpu.memory_space<vmem>>, vector<8x256xf32>
    tpu.vector_store %arg4[%c0_10, %c0_11], %11 {strides = array<i32>} : memref<8x256xf32, #tpu.memory_space<vmem>>, vector<8x256xf32>,
    %13 = arith.mulf %0, %0 : vector<8x256xf32>
    %c0_12 = arith.constant 0 : index
    %c0_13 = arith.constant 0 : index
    %14 = vector.load %arg5[%c0_12, %c0_13] : memref<8x256xf32, #tpu.memory_space<vmem>>, vector<8x256xf32>
    tpu.vector_store %arg5[%c0_12, %c0_13], %13 {strides = array<i32>} : memref<8x256xf32, #tpu.memory_space<vmem>>, vector<8x256xf32>,
    %cst_14 = arith.constant 1.000000e+00 : f32
    %15 = vector.broadcast %cst_14 : f32 to vector<8x256xf32>
    %16 = arith.cmpf ogt, %0, %15 : vector<8x256xf32>
    %17 = arith.extui %16 : vector<8x256xi1> to vector<8x256xi8>
    %c0_15 = arith.constant 0 : index
    %c0_16 = arith.constant 0 : index
    %18 = vector.load %arg6[%c0_15, %c0_16] : memref<8x256xi8, #tpu.memory_space<vmem>>, vector<8x256xi8>
    tpu.vector_store %arg6[%c0_15, %c0_16], %17 {strides = array<i32>} : memref<8x256xi8, #tpu.memory_space<vmem>>, vector<8x256xi8>,
    return
  }
}

</mosaic_0001>

<bundles_post_ra>
// kernel: pt_module_forward.1
= control target key start
LH: loop header
LB: loop body
LE: loop exit
PB: predicated region body
PF: predicated region fallthrough
CT: control target
= control target key end

     0   :  { %v84_v9 = vmov 0   ;;  %s159_s0 = inlined_call_operand.vmem [shape: f32[8,256], index: 0, kind: input, shape index: {}]   ;;  %s160_s1 = inlined_call_operand.vmem [shape: f32[8,256], index: 1, kind: output, shape index: {0}]   ;;  %s161_s2 = inlined_call_operand.vmem [shape: f32[8,256], index: 2, kind: output, shape index: {1}]   ;;  %s162_s3 = inlined_call_operand.vmem [shape: f32[8,256], index: 3, kind: output, shape index: {2}]   ;;  %s163_s4 = inlined_call_operand.vmem [shape: f32[8,256], index: 4, kind: output, shape index: {3}]   ;;  %s164_s5 = inlined_call_operand.vmem [shape: f32[8,256], index: 5, kind: output, shape index: {4}]   ;;  %s165_s6 = inlined_call_operand.vmem [shape: s8[8,256], index: 6, kind: output, shape index: {5}]  }
   0x1   :  { %v16_v0 = vld [vmem:[%s159_s0] sm:$0xff]  ;;  %v17_v1 = vld [vmem:[%s159_s0 + $0x8] sm:$0xff] }
   0x2   :  { %v18_v2 = vadd.f32 2.0, %v16_v0  ;;  %v19_v3 = vadd.f32 2.0, %v17_v1  ;;  %v81_v4 = vadd.f32 -2.0, %v16_v0  ;;  %v82_v5 = vadd.f32 -2.0, %v17_v1 }
   0x3   :  { %v26_v6 = vmul.f32 2.0, %v16_v0  ;;  %vm38_vm0 = vcmp.gt.f32.partialorder %v16_v0, 1.0  ;;  %vm39_vm1 = vcmp.gt.f32.partialorder %v17_v1, 1.0  ;;  %v27_v7 = vmul.f32 2.0, %v17_v1 }
   0x4   :  { %20 = vst [vmem:[%s160_s1] sm:$0xff] %v18_v2  ;;  %vm40_vm2 = vmpackc.low %vm38_vm0, %vm38_vm0  ;;  %v30_v8 = vmul.f32 0.5, %v16_v0  ;;  %v31_v11 = vmul.f32 0.5, %v17_v1  ;;  %v34_v14 = vmul.f32 %v16_v0, %v16_v0  ;;  %v35_v16 = vmul.f32 %v17_v1, %v17_v1 }
   0x5   :  { %21 = vst [vmem:[%s160_s1 + $0x8] sm:$0xff] %v19_v3  ;;  %v41_v10 = vsel %vm40_vm2, 16711935, %v84_v9  ;;  %vm45_vm3 = vmpackc.low %vm39_vm1, %vm39_vm1 }
   0x6   :  { %24 = vst [vmem:[%s161_s2] sm:$0xff] %v81_v4  ;;  %v43_v12 = vpack.c.b8 %v41_v10, %v41_v10  ;;  %v46_v13 = vsel %vm45_vm3, 16711935, %v84_v9 }
   0x7   :  { %25 = vst [vmem:[%s161_s2 + $0x8] sm:$0xff] %v82_v5  ;;  %v48_v15 = vpack.c.b8 %v46_v13, %v46_v13 }
   0x8   :  { %28 = vst [vmem:[%s162_s3] sm:$0xff] %v26_v6  ;;  %vm44_vm4 = vnez %v43_v12 }
   0x9   :  { %29 = vst [vmem:[%s162_s3 + $0x8] sm:$0xff] %v27_v7  ;;  %vm49_vm5 = vnez %v48_v15  ;;  %v50_v17 = vsel %vm44_vm4, 16843009, %v84_v9 }
   0xa   :  { %32 = vst [vmem:[%s163_s4] sm:$0xff] %v30_v8  ;;  %v51_v18 = vsel %vm49_vm5, 16843009, %v84_v9  ;;  %v52_v19 = vunpack.c.0.s8 %v50_v17 }
   0xb   :  { %33 = vst [vmem:[%s163_s4 + $0x8] sm:$0xff] %v31_v11  ;;  %v53_v20 = vunpack.c.0.s8 %v51_v18 }
   0xc   :  { %36 = vst [vmem:[%s164_s5] sm:$0xff] %v34_v14 }
   0xd   :  { %37 = vst [vmem:[%s164_s5 + $0x8] sm:$0xff] %v35_v16  ;;  %v54_v21 = vpack.c.b16 %v53_v20, %v52_v19 }
   0xf   :  { %v55_v22 = vpack.c.b8 %v54_v21, %v54_v21 }
  0x11   :  { %56 = vst [vmem:[%s165_s6] sm:$0xf] %v55_v22 }

</bundles_post_ra>
